<compile_context>
chip_gen: v7x
topology: tpu7x:2x2x1
jax: 0.10.0
libtpu: 0.0.40
codegen_flags: <defaults>
</compile_context>

<pallas_src>
import functools
import math

import jax
import jax.numpy as jnp
from jax.experimental import pallas as pl
from jax.experimental.pallas import tpu as pltpu


def _round_up(n, m):
    return ((n + m - 1) // m) * m


def _tpu_vmem_and_cores():
    """Return (vmem_capacity_bytes, tensorcores_per_chip) with safe fallbacks."""
    cap = None
    try:
        cap = getattr(pltpu.get_tpu_info(), "vmem_capacity_bytes", None)
    except Exception:
        cap = None
    kind = ""
    try:
        kind = jax.devices()[0].device_kind.lower()
    except Exception:
        pass
    if cap is None or not isinstance(cap, int) or cap <= 0:
        if "v5" in kind or "v6" in kind:
            cap = 128 * 1024 * 1024
        else:
            cap = 64 * 1024 * 1024          # conservative: v7x is 64 MiB per TC
    cores = 2 if ("v7" in kind or "7x" in kind) else 1
    return int(cap), cores


def _weight_spec(block_shape, index_map, buffered):
    """BlockSpec for a streamed weight slab; deeper pipelining when streaming."""
    if buffered:
        try:
            return pl.BlockSpec(block_shape, index_map, pipeline_mode=pl.Buffered(3))
        except TypeError:
            # Older Pallas without pipeline_mode kwarg: default double-buffering.
            return pl.BlockSpec(block_shape, index_map)
    return pl.BlockSpec(block_shape, index_map)


def _layernorm_residual(acc_f32, x_ref, b2_ref, g_ref, beta_ref, o_ref, eps):
    """bias + residual + LayerNorm in f32, write out in the output dtype."""
    r = (acc_f32
         + b2_ref[...].astype(jnp.float32)
         + x_ref[...].astype(jnp.float32))
    mean = jnp.mean(r, axis=-1, keepdims=True)
    cent = r - mean
    var = jnp.mean(cent * cent, axis=-1, keepdims=True)
    inv = jax.lax.rsqrt(var + eps)
    out = (cent * inv * g_ref[...].astype(jnp.float32)
           + beta_ref[...].astype(jnp.float32))
    o_ref[...] = out.astype(o_ref.dtype)


# ---------------------------------------------------------------------------
# Resident-weight kernel: 1-D row grid, weights live in VMEM for the whole call.
# ---------------------------------------------------------------------------
def _ffn_kernel_resident(x_ref, w1_ref, b1_ref, w2_ref, b2_ref, g_ref, beta_ref,
                         o_ref, *, eps):
    x = x_ref[...]
    h = jnp.dot(x, w1_ref[...], preferred_element_type=jnp.float32)
    # Fused bias + ReLU + cast back to the MXU input dtype in one pass.
    h = jnp.maximum(h + b1_ref[...].astype(jnp.float32), 0.0).astype(w2_ref.dtype)
    y = jnp.dot(h, w2_ref[...], preferred_element_type=jnp.float32)
    _layernorm_residual(y, x_ref, b2_ref, g_ref, beta_ref, o_ref, eps)


# ---------------------------------------------------------------------------
# Streaming kernel: grid = (row tiles, H tiles); f32 accumulator in VMEM.
# ---------------------------------------------------------------------------
def _ffn_kernel_stream(x_ref, w1_ref, b1_ref, w2_ref, b2_ref, g_ref, beta_ref,
                       o_ref, acc_ref, *, eps):
    k = pl.program_id(1)
    nk = pl.num_programs(1)

    h = jnp.dot(x_ref[...], w1_ref[...], preferred_element_type=jnp.float32)
    h = jnp.maximum(h + b1_ref[...].astype(jnp.float32), 0.0).astype(w2_ref.dtype)
    part = jnp.dot(h, w2_ref[...], preferred_element_type=jnp.float32)

    # Direct store on the first reduction step (no zero-init + read-modify-write).
    @pl.when(k == 0)
    def _first():
        acc_ref[...] = part

    @pl.when(k != 0)
    def _rest():
        acc_ref[...] += part

    @pl.when(k == nk - 1)
    def _finalize():
        # Padded tail rows (M not a multiple of tm) may hold undefined data;
        # LayerNorm is row-independent so any garbage there never contaminates
        # valid rows and is discarded on writeback.
        _layernorm_residual(acc_ref[...], x_ref, b2_ref, g_ref, beta_ref, o_ref, eps)


def position_wise_feed_forward(x, w1, b1, w2, b2, gamma, beta,
                               *, eps=1e-5, tm=None, th=None):
    """x: [B, S, D]; w1 (D,H), b1 (H,), w2 (H,D), b2 (D,), gamma/beta (D,).
    Returns [B, S, D]. Dropout(p=0) is an identity (eval semantics)."""
    B, S, D = x.shape
    H = w1.shape[1]
    M = B * S
    x2 = x.reshape(M, D)
    itemsize = jnp.dtype(x.dtype).itemsize

    vmem_cap, n_cores = _tpu_vmem_and_cores()
    vmem_budget = int(vmem_cap * 0.75)

    # Row-tile floor for dense sublane packing of the input dtype.
    row_floor = 8 if itemsize >= 4 else (16 if itemsize == 2 else 32)
    m_pad = _round_up(M, row_floor)

    # ---- hidden-dim tiling: prefer fully-resident weights --------------------
    if th is None:
        resident_bytes = 2 * (2 * D * H * itemsize)   # w1+w2, x2 double-buffer
        th = H if resident_bytes <= vmem_budget // 2 else 512
    if th >= H:
        th, Hp = H, H
    else:
        th = max(128, (th // 128) * 128)
        # Cap th so double-buffered weight slabs stay well under budget (v7x guard).
        while 2 * (2 * D * th * itemsize) > vmem_budget // 2 and th > 128:
            th -= 128
        Hp = _round_up(H, th)                          # zero-pad H: exact math
    nk = max(1, Hp // th)
    resident = (nk == 1)

    if Hp > H:
        w1 = jnp.pad(w1, ((0, 0), (0, Hp - H)))
        b1 = jnp.pad(b1, ((0, Hp - H),))
        w2 = jnp.pad(w2, ((0, Hp - H), (0, 0)))

    # ---- row tiling: generation-aware ---------------------------------------
    if tm is None:
        if resident:
            tm = 256                                   # weights are not re-streamed
        else:
            # arithmetic intensity of this schedule = tm flops per weight byte
            tm = 768 if vmem_cap >= 96 * 1024 * 1024 else 512
    tm = min(tm, m_pad)
    if tm >= 128:
        tm = (tm // 128) * 128
    else:
        tm = _round_up(max(tm, row_floor), row_floor)

    # Megacore (v7x): make sure the parallel row axis has >= 2 blocks.
    if n_cores >= 2 and pl.cdiv(m_pad, tm) < 2 and m_pad >= 2 * row_floor:
        half = _round_up((m_pad + 1) // 2, row_floor)
        if half >= 128:
            half = _round_up(half, 128)
        tm = max(row_floor, min(tm, half))

    # ---- VMEM fit check: shrink tm until the whole working set fits ----------
    def _vmem_est(tm_):
        w = 2 * 2 * D * th * itemsize                 # weight slabs (double-buffered)
        xo = 2 * 2 * tm_ * D * itemsize               # x + out tiles (double-buffered)
        acc = tm_ * D * 4 if not resident else 0      # f32 accumulator scratch
        interm = tm_ * th * 4 + tm_ * D * 4           # fc1 f32 tile + finalize f32
        return w + xo + acc + interm

    while _vmem_est(tm) > vmem_budget and tm > row_floor:
        tm = max(row_floor, (tm // 2 // row_floor) * row_floor)

    n_row_tiles = pl.cdiv(m_pad, tm)

    # 2-D parameter views so everything lands cleanly in VMEM tiles.
    b1_2 = b1.reshape(1, Hp)
    b2_2 = b2.reshape(1, D)
    g_2 = gamma.reshape(1, D)
    be_2 = beta.reshape(1, D)

    # Accurate (advisory) cost: weights are re-streamed per row tile only when
    # the streaming schedule is used.
    weight_reads = (n_row_tiles if not resident else 1) * 2 * D * Hp * itemsize
    cost = pl.CostEstimate(
        flops=4 * M * D * Hp,
        transcendentals=M,
        bytes_accessed=int(2 * M * D * itemsize + weight_reads
                           + (Hp + 3 * D) * itemsize),
    )
    cparams = pltpu.CompilerParams(
        dimension_semantics=("parallel",) if resident else ("parallel", "arbitrary"),
        vmem_limit_bytes=vmem_budget,
    )

    if resident:
        grid_spec = pltpu.PrefetchScalarGridSpec(
            num_scalar_prefetch=0,
            grid=(n_row_tiles,),
            in_specs=[
                pl.BlockSpec((tm, D), lambda i: (i, 0)),    # x rows tile
                pl.BlockSpec((D, Hp), lambda i: (0, 0)),    # w1 (resident)
                pl.BlockSpec((1, Hp), lambda i: (0, 0)),    # b1
                pl.BlockSpec((Hp, D), lambda i: (0, 0)),    # w2 (resident)
                pl.BlockSpec((1, D), lambda i: (0, 0)),     # b2
                pl.BlockSpec((1, D), lambda i: (0, 0)),     # gamma
                pl.BlockSpec((1, D), lambda i: (0, 0)),     # beta
            ],
            out_specs=pl.BlockSpec((tm, D), lambda i: (i, 0)),
            scratch_shapes=[],
        )
        kernel = functools.partial(_ffn_kernel_resident, eps=eps)
    else:
        grid_spec = pltpu.PrefetchScalarGridSpec(
            num_scalar_prefetch=0,
            grid=(n_row_tiles, nk),
            in_specs=[
                pl.BlockSpec((tm, D), lambda i, k: (i, 0)),             # x rows tile
                _weight_spec((D, th), lambda i, k: (0, k), True),       # w1 H-slice
                pl.BlockSpec((1, th), lambda i, k: (0, k)),             # b1 H-slice
                _weight_spec((th, D), lambda i, k: (k, 0), True),       # w2 H-slice
                pl.BlockSpec((1, D), lambda i, k: (0, 0)),              # b2
                pl.BlockSpec((1, D), lambda i, k: (0, 0)),              # gamma
                pl.BlockSpec((1, D), lambda i, k: (0, 0)),              # beta
            ],
            out_specs=pl.BlockSpec((tm, D), lambda i, k: (i, 0)),
            scratch_shapes=[pltpu.VMEM((tm, D), jnp.float32)],          # f32 acc
        )
        kernel = functools.partial(_ffn_kernel_stream, eps=eps)

    out2 = pl.pallas_call(
        kernel,
        out_shape=jax.ShapeDtypeStruct((M, D), x.dtype),
        grid_spec=grid_spec,
        compiler_params=cparams,
        cost_estimate=cost,
    )(x2, w1, b1_2, w2, b2_2, g_2, be_2)

    return out2.reshape(B, S, D)


def _reference(x, w1, b1, w2, b2, gamma, beta, eps=1e-5):
    h = jnp.maximum(x @ w1 + b1, 0.0)
    y = h @ w2 + b2
    r = y + x
    mean = jnp.mean(r, axis=-1, keepdims=True)
    var = jnp.mean((r - mean) ** 2, axis=-1, keepdims=True)
    return (r - mean) / jnp.sqrt(var + eps) * gamma + beta


if __name__ == "__main__":
    # Small shapes consistent with the module: x = [batch, seq, dim_model]
    B, S, D, Hid = 2, 8, 16, 32

    key = jax.random.PRNGKey(0)
    kx, k1, k2, k3, k4 = jax.random.split(key, 5)

    x = jax.random.normal(kx, (B, S, D), dtype=jnp.float32)

    # Deterministic parameter init (PyTorch-style uniform +/- 1/sqrt(fan_in)).
    lim1 = 1.0 / jnp.sqrt(D)
    lim2 = 1.0 / jnp.sqrt(Hid)
    w1 = jax.random.uniform(k1, (D, Hid), jnp.float32, -lim1, lim1)
    b1 = jax.random.uniform(k2, (Hid,), jnp.float32, -lim1, lim1)
    w2 = jax.random.uniform(k3, (Hid, D), jnp.float32, -lim2, lim2)
    b2 = jax.random.uniform(k4, (D,), jnp.float32, -lim2, lim2)
    gamma = jnp.ones((D,), jnp.float32)
    beta = jnp.zeros((D,), jnp.float32)

    out = position_wise_feed_forward(x, w1, b1, w2, b2, gamma, beta)
    out = jax.block_until_ready(out)

    ref = _reference(x, w1, b1, w2, b2, gamma, beta)
    assert out.shape == (B, S, D)
    assert jnp.allclose(out, ref, atol=1e-5, rtol=1e-5), "mismatch vs reference"

    # Exercise the streaming (multi-k) path too on a slightly larger shape.
    B2, S2, D2, H2 = 2, 64, 256, 1024
    k5, k6, k7, k8, k9 = jax.random.split(jax.random.PRNGKey(1), 5)
    x_b = jax.random.normal(k5, (B2, S2, D2), dtype=jnp.float32)
    w1_b = jax.random.uniform(k6, (D2, H2), jnp.float32, -0.05, 0.05)
    b1_b = jax.random.uniform(k7, (H2,), jnp.float32, -0.05, 0.05)
    w2_b = jax.random.uniform(k8, (H2, D2), jnp.float32, -0.05, 0.05)
    b2_b = jax.random.uniform(k9, (D2,), jnp.float32, -0.05, 0.05)
    g_b = jnp.ones((D2,), jnp.float32)
    be_b = jnp.zeros((D2,), jnp.float32)
    out_b = position_wise_feed_forward(x_b, w1_b, b1_b, w2_b, b2_b, g_b, be_b,
                                       th=256)   # force the streaming schedule
    out_b = jax.block_until_ready(out_b)
    ref_b = _reference(x_b, w1_b, b1_b, w2_b, b2_b, g_b, be_b)
    assert jnp.allclose(out_b, ref_b, atol=2e-4, rtol=2e-4), "streaming mismatch"

    print("KERNEL_OK")
</pallas_src>

<mosaic_0001>
module attributes {stable_mosaic.version = 11 : i64} {
  func.func @_ffn_kernel_resident(%arg0: i32, %arg1: memref<16x16xf32, #tpu.memory_space<vmem>>, %arg2: memref<16x32xf32, #tpu.memory_space<vmem>>, %arg3: memref<1x32xf32, #tpu.memory_space<vmem>>, %arg4: memref<32x16xf32, #tpu.memory_space<vmem>>, %arg5: memref<1x16xf32, #tpu.memory_space<vmem>>, %arg6: memref<1x16xf32, #tpu.memory_space<vmem>>, %arg7: memref<1x16xf32, #tpu.memory_space<vmem>>, %arg8: memref<16x16xf32, #tpu.memory_space<vmem>>) attributes {dimension_semantics = [#tpu.dimension_semantics<parallel>], iteration_bounds = array<i64: 1>, scalar_prefetch = 0 : i64, scratch_operands = 0 : i64, tpu.core_type = #tpu.core_type<tc>, window_params = [{transform_indices = @transform_0, window_bounds = array<i64: 16, 16>}, {pipeline_mode = #tpu.pipeline_mode<synchronous>, transform_indices = @transform_1, window_bounds = array<i64: 16, 32>}, {pipeline_mode = #tpu.pipeline_mode<synchronous>, transform_indices = @transform_2, window_bounds = array<i64: 1, 32>}, {pipeline_mode = #tpu.pipeline_mode<synchronous>, transform_indices = @transform_3, window_bounds = array<i64: 32, 16>}, {pipeline_mode = #tpu.pipeline_mode<synchronous>, transform_indices = @transform_4, window_bounds = array<i64: 1, 16>}, {pipeline_mode = #tpu.pipeline_mode<synchronous>, transform_indices = @transform_5, window_bounds = array<i64: 1, 16>}, {pipeline_mode = #tpu.pipeline_mode<synchronous>, transform_indices = @transform_6, window_bounds = array<i64: 1, 16>}, {transform_indices = @transform_7, window_bounds = array<i64: 16, 16>}]} {
    %c0 = arith.constant 0 : index
    %c0_0 = arith.constant 0 : index
    %0 = vector.load %arg1[%c0, %c0_0] : memref<16x16xf32, #tpu.memory_space<vmem>>, vector<16x16xf32>
    %c0_1 = arith.constant 0 : index
    %c0_2 = arith.constant 0 : index
    %1 = vector.load %arg2[%c0_1, %c0_2] : memref<16x32xf32, #tpu.memory_space<vmem>>, vector<16x32xf32>
    %cst = arith.constant dense<0.000000e+00> : vector<16x32xf32>
    %2 = tpu.matmul %0, %1, %cst {dimension_numbers = #tpu.dot_dimension_numbers<[1], [0], [0], [1], [0, 0, 1, 1], [], []>} : vector<16x16xf32>, vector<16x32xf32>, vector<16x32xf32> -> vector<16x32xf32>
    %c0_3 = arith.constant 0 : index
    %c0_4 = arith.constant 0 : index
    %3 = vector.load %arg3[%c0_3, %c0_4] : memref<1x32xf32, #tpu.memory_space<vmem>>, vector<1x32xf32>
    %4 = vector.broadcast %3 : vector<1x32xf32> to vector<16x32xf32>
    %5 = arith.addf %2, %4 : vector<16x32xf32>
    %cst_5 = arith.constant 0.000000e+00 : f32
    %6 = vector.broadcast %cst_5 : f32 to vector<16x32xf32>
    %7 = arith.maximumf %5, %6 : vector<16x32xf32>
    %c0_6 = arith.constant 0 : index
    %c0_7 = arith.constant 0 : index
    %8 = vector.load %arg4[%c0_6, %c0_7] : memref<32x16xf32, #tpu.memory_space<vmem>>, vector<32x16xf32>
    %cst_8 = arith.constant dense<0.000000e+00> : vector<16x16xf32>
    %9 = tpu.matmul %7, %8, %cst_8 {dimension_numbers = #tpu.dot_dimension_numbers<[1], [0], [0], [1], [0, 0, 1, 1], [], []>} : vector<16x32xf32>, vector<32x16xf32>, vector<16x16xf32> -> vector<16x16xf32>
    %c0_9 = arith.constant 0 : index
    %c0_10 = arith.constant 0 : index
    %10 = vector.load %arg5[%c0_9, %c0_10] : memref<1x16xf32, #tpu.memory_space<vmem>>, vector<1x16xf32>
    %11 = vector.broadcast %10 : vector<1x16xf32> to vector<16x16xf32>
    %12 = arith.addf %9, %11 : vector<16x16xf32>
    %c0_11 = arith.constant 0 : index
    %c0_12 = arith.constant 0 : index
    %13 = vector.load %arg1[%c0_11, %c0_12] : memref<16x16xf32, #tpu.memory_space<vmem>>, vector<16x16xf32>
    %14 = arith.addf %12, %13 : vector<16x16xf32>
    %cst_13 = arith.constant dense<0.000000e+00> : vector<16xf32>
    %15 = vector.multi_reduction <add>, %14, %cst_13 [1] : vector<16x16xf32> to vector<16xf32>
    %16 = vector.shape_cast %15 : vector<16xf32> to vector<16x1xf32>
    %cst_14 = arith.constant 1.600000e+01 : f32
    %17 = vector.broadcast %cst_14 : f32 to vector<16x1xf32>
    %18 = arith.divf %16, %17 : vector<16x1xf32>
    %19 = vector.broadcast %18 : vector<16x1xf32> to vector<16x16xf32>
    %20 = arith.subf %14, %19 : vector<16x16xf32>
    %21 = arith.mulf %20, %20 : vector<16x16xf32>
    %cst_15 = arith.constant dense<0.000000e+00> : vector<16xf32>
    %22 = vector.multi_reduction <add>, %21, %cst_15 [1] : vector<16x16xf32> to vector<16xf32>
    %23 = vector.shape_cast %22 : vector<16xf32> to vector<16x1xf32>
    %cst_16 = arith.constant 1.600000e+01 : f32
    %24 = vector.broadcast %cst_16 : f32 to vector<16x1xf32>
    %25 = arith.divf %23, %24 : vector<16x1xf32>
    %cst_17 = arith.constant 9.99999974E-6 : f32
    %26 = vector.broadcast %cst_17 : f32 to vector<16x1xf32>
    %27 = arith.addf %25, %26 : vector<16x1xf32>
    %28 = math.rsqrt %27 : vector<16x1xf32>
    %29 = vector.broadcast %28 : vector<16x1xf32> to vector<16x16xf32>
    %30 = arith.mulf %20, %29 : vector<16x16xf32>
    %c0_18 = arith.constant 0 : index
    %c0_19 = arith.constant 0 : index
    %31 = vector.load %arg6[%c0_18, %c0_19] : memref<1x16xf32, #tpu.memory_space<vmem>>, vector<1x16xf32>
    %32 = vector.broadcast %31 : vector<1x16xf32> to vector<16x16xf32>
    %33 = arith.mulf %30, %32 : vector<16x16xf32>
    %c0_20 = arith.constant 0 : index
    %c0_21 = arith.constant 0 : index
    %34 = vector.load %arg7[%c0_20, %c0_21] : memref<1x16xf32, #tpu.memory_space<vmem>>, vector<1x16xf32>
    %35 = vector.broadcast %34 : vector<1x16xf32> to vector<16x16xf32>
    %36 = arith.addf %33, %35 : vector<16x16xf32>
    %c0_22 = arith.constant 0 : index
    %c0_23 = arith.constant 0 : index
    %37 = vector.load %arg8[%c0_22, %c0_23] : memref<16x16xf32, #tpu.memory_space<vmem>>, vector<16x16xf32>
    tpu.vector_store %arg8[%c0_22, %c0_23], %36 {strides = array<i32>} : memref<16x16xf32, #tpu.memory_space<vmem>>, vector<16x16xf32>,
    return
  }
  func.func @transform_0(%arg0: i32) -> (i32, i32) {
    %c0_i32 = arith.constant 0 : i32
    %c0_i32_0 = arith.constant 0 : i32
    return %arg0, %c0_i32 : i32, i32
  }
  func.func @transform_1(%arg0: i32) -> (i32, i32) {
    %c0_i32 = arith.constant 0 : i32
    %c0_i32_0 = arith.constant 0 : i32
    %c0_i32_1 = arith.constant 0 : i32
    return %c0_i32, %c0_i32_0 : i32, i32
  }
  func.func @transform_2(%arg0: i32) -> (i32, i32) {
    %c0_i32 = arith.constant 0 : i32
    %c0_i32_0 = arith.constant 0 : i32
    %c0_i32_1 = arith.constant 0 : i32
    return %c0_i32, %c0_i32_0 : i32, i32
  }
  func.func @transform_3(%arg0: i32) -> (i32, i32) {
    %c0_i32 = arith.constant 0 : i32
    %c0_i32_0 = arith.constant 0 : i32
    %c0_i32_1 = arith.constant 0 : i32
    return %c0_i32, %c0_i32_0 : i32, i32
  }
  func.func @transform_4(%arg0: i32) -> (i32, i32) {
    %c0_i32 = arith.constant 0 : i32
    %c0_i32_0 = arith.constant 0 : i32
    %c0_i32_1 = arith.constant 0 : i32
    return %c0_i32, %c0_i32_0 : i32, i32
  }
  func.func @transform_5(%arg0: i32) -> (i32, i32) {
    %c0_i32 = arith.constant 0 : i32
    %c0_i32_0 = arith.constant 0 : i32
    %c0_i32_1 = arith.constant 0 : i32
    return %c0_i32, %c0_i32_0 : i32, i32
  }
  func.func @transform_6(%arg0: i32) -> (i32, i32) {
    %c0_i32 = arith.constant 0 : i32
    %c0_i32_0 = arith.constant 0 : i32
    %c0_i32_1 = arith.constant 0 : i32
    return %c0_i32, %c0_i32_0 : i32, i32
  }
  func.func @transform_7(%arg0: i32) -> (i32, i32) {
    %c0_i32 = arith.constant 0 : i32
    %c0_i32_0 = arith.constant 0 : i32
    return %arg0, %c0_i32 : i32, i32
  }
}

</mosaic_0001>

<bundles_post_ra>
// kernel: tpu_custom_call.1
= control target key start
LH: loop header
LB: loop body
LE: loop exit
PB: predicated region body
PF: predicated region fallthrough
CT: control target
= control target key end

     0   :  { %vm38_vm0 = vcmask 130048   ;;  %s458_s0 = inlined_call_operand.vmem [shape: f32[16,16], index: 0, kind: input, shape index: {}]   ;;  %s459_s1 = inlined_call_operand.vmem [shape: f32[16,32], index: 1, kind: input, shape index: {}]   ;;  %s460_s2 = inlined_call_operand.vmem [shape: f32[1,32], index: 2, kind: input, shape index: {}]   ;;  %s461_s3 = inlined_call_operand.vmem [shape: f32[32,16], index: 3, kind: input, shape index: {}]   ;;  %s462_s4 = inlined_call_operand.vmem [shape: f32[1,16], index: 4, kind: input, shape index: {}]   ;;  %s463_s5 = inlined_call_operand.vmem [shape: f32[1,16], index: 5, kind: input, shape index: {}]   ;;  %s464_s6 = inlined_call_operand.vmem [shape: f32[1,16], index: 6, kind: input, shape index: {}]   ;;  %s465_s7 = inlined_call_operand.hbm [shape: f32[16,16], index: 7, kind: output, shape index: {}]  }
   0x1   :  { %v29_v0 = vld [vmem:[%s459_s1] sm:$0xff]  ;;  %v30_v1 = vld [vmem:[%s459_s1 + $0x8] sm:$0xff] }
   0x2   :  { %v27_v2 = vld [vmem:[%s458_s0] sm:$0xff]  ;;  %v316_v3 = vpack.c.bf16 %v30_v1, %v29_v0  ;;  %v123_v5 = vld [vmem:[%s461_s3 + $0x8] sm:$0xff] }
   0x3   :  { %302 = vmatprep.mubr.msk.f32.mxu0 %vm38_vm0, %v27_v2  ;;  %v122_v4 = vld [vmem:[%s461_s3] sm:$0xff] }
   0x4   :  { %v320_v6 = vpack.c.bf16 %v123_v5, %v122_v4 }
   0x5   :  { %12 = vsyncpa [#allocation3], 0  ;;  %317 = vmatprep.subr.bf16.mxu0 %v316_v3  ;;  %v28_v7 = vld [vmem:[%s458_s0 + $0x8] sm:$0xff]  ;;  %v124_v8 = vld [vmem:[%s461_s3 + $0x10] sm:$0xff]  ;;  %vm133_vm1 = vcmask 261120   ;;  %s359_s20 = smov [#allocation2]  }
   0x6   :  { %319 = vmatpush3.bf16.msra.mxu0 %v316_v3  ;;  %321 = vmatprep.subr.bf16.mxu1 %v320_v6  ;;  %v125_v9 = vld [vmem:[%s461_s3 + $0x18] sm:$0xff]  ;;  %v280_v11 = vld [vmem:[%s460_s2] ss:$0 sm:$0xff]  ;;  %s269_s21 = sshll.u32 %s359_s20, 4  ;;  %s270_s21 = int_to_ptr.vmem [resolvable:$true] %s269_s21 }
   0x7   :  { %323 = vmatpush3.bf16.msra.mxu1 %v320_v6  ;;  %v324_v10 = vpack.c.bf16 %v125_v9, %v124_v8  ;;  %v283_v18 = vld [vmem:[%s462_s4] ss:$0 sm:$0xff]  ;;  %s335_s22 = scalar_lea.vmem %s270_s21, 256  ;;  %p340_p1 = scmp.lt.s32.totalorder %s270_s21, %s270_s21 }
   0x8   :  { %v286_v44 = vld [vmem:[%s463_s5] ss:$0 sm:$0xff]  ;;  %p336_p0 = scmp.ne.s32.totalorder %s270_s21, %s335_s22  ;;  %p341_p2 = scmp.lt.s32.totalorder %s335_s22, %s335_s22 }
   0x9   :  { %303 = vmatmul.mubr.msk.f32.vlgmr.msra.gmra.mrb[0].mxu0 %vm38_vm0, %v28_v7  ;;  %325 = vmatprep.subr.bf16.mxu1 %v324_v10  ;;  %v287_v46 = vld [vmem:[%s464_s6] ss:$0 sm:$0xff] }
   0xa   :  { %p342_p3 = por %p341_p2, %p340_p1 }
   0xb   :  { %327 = vmatpush3.bf16.msra.mxu1 %v324_v10 }
   0xc   :  { %p343_p4 = pnand %p342_p3, %p336_p0 }
  0xdc   :  { %v304_v12 = vpop.f32.mrb[0].mxu0 }
  0xdd   :  { %v117_v13 = vadd.f32 %v304_v12, %v280_v11  ;;  %v111_v14 = vpop.f32.mrb[1].mxu0 }
  0xde   :  { %v112_v15 = vadd.f32 %v280_v11, %v111_v14 }
  0xdf   :  { %v121_v17 = vmax.f32 %v117_v13, 0.0 }
  0xe0   :  { %v120_v16 = vmax.f32 %v112_v15, 0.0 }
  0xe2   :  { %313 = vmatprep.mubr.msk.f32.mxu1 %vm133_vm1, %v120_v16 }
  0xe3   :  { %314 = vmatmul.mubr.msk.f32.vlgmr.msra.gmra.mrb[0].mxu1 %vm133_vm1, %v121_v17 }
 0x1b6   :  { %v315_v19 = vpop.f32.mrb[0].mxu1 }
 0x1b7   :  { %v206_v20 = vpop.f32.mrb[1].mxu1  ;;  %v212_v21 = vadd.f32 %v315_v19, %v283_v18 }
 0x1b8   :  { %v207_v22 = vadd.f32 %v283_v18, %v206_v20 }
 0x1b9   :  { %v216_v25 = vadd.f32 %v212_v21, %v28_v7 }
 0x1ba   :  { %v215_v23 = vadd.f32 %v207_v22, %v27_v2 }
 0x1bb   :  { %v220_v26 = vsel %vm38_vm0, %v216_v25, 0.0 }
 0x1bc   :  { %v217_v24 = vsel %vm38_vm0, %v215_v23, 0.0 }
 0x1bd   :  { %218 = vadd.xlane.f32.xlu0 %v217_v24 }
 0x1c1   :  { %221 = vadd.xlane.f32.xlu0 %v220_v26 }
 0x24a   :  { %v219_v27 = vpop.xlane.xlu0 %218 }
 0x24b   :  { %v224_v28 = vmul.f32 0.0625, %v219_v27 }
 0x24d   :  { %v226_v29 = vsub.f32 %v215_v23, %v224_v28 }
 0x24e   :  { %v222_v30 = vpop.xlane.xlu0 %221 }
 0x24f   :  { %v225_v31 = vmul.f32 0.0625, %v222_v30  ;;  %v228_v32 = vmul.f32 %v226_v29, %v226_v29 }
 0x251   :  { %v227_v33 = vsub.f32 %v216_v25, %v225_v31  ;;  %v230_v34 = vsel %vm38_vm0, %v228_v32, 0.0 }
 0x252   :  { %231 = vadd.xlane.f32.xlu1 %v230_v34 }
 0x253   :  { %v229_v35 = vmul.f32 %v227_v33, %v227_v33 }
 0x255   :  { %v233_v36 = vsel %vm38_vm0, %v229_v35, 0.0 }
 0x256   :  { %234 = vadd.xlane.f32.xlu1 %v233_v36 }
 0x2df   :  { %v232_v37 = vpop.xlane.xlu1 %231 }
 0x2e0   :  { %v236_v38 = vmul.f32 0.0625, %v232_v37 }
 0x2e2   :  { %v238_v39 = vadd.f32 1e-05, %v236_v38 }
 0x2e3   :  { %v235_v40 = vpop.xlane.xlu1 %234 }
 0x2e4   :  { %331 = vrsqrt.f32 %v238_v39  ;;  %v237_v41 = vmul.f32 0.0625, %v235_v40 }
 0x2e6   :  { %v239_v42 = vadd.f32 1e-05, %v237_v41 }
 0x2e8   :  { %333 = vrsqrt.f32 %v239_v42 }
 0x2ee   :  { %v332_v43 = vpop.eup %331 }
 0x2ef   :  { %v242_v45 = vmul.f32 %v332_v43, %v226_v29 }
 0x2f1   :  { %v251_v47 = vmul.f32 %v286_v44, %v242_v45 }
 0x2f2   :  { %v334_v48 = vpop.eup %333 }
 0x2f3   :  { %v243_v49 = vmul.f32 %v334_v48, %v227_v33  ;;  %v260_v50 = vadd.f32 %v287_v46, %v251_v47 }
 0x2f5   :  { %v252_v51 = vmul.f32 %v286_v44, %v243_v49  ;;  %262 = vst.msk [vmem:[#allocation2] sm:$0xff] %vm38_vm0, %v260_v50 }
 0x2f7   :  { %v261_v52 = vadd.f32 %v287_v46, %v252_v51 }
 0x2f9   :  { %263 = vst.msk [vmem:[#allocation2 + $0x8] sm:$0xff] %vm38_vm0, %v261_v52 }
 0x2fa   :  { %346 = shalt.err (!%p343_p4)
}
 0x2fb   :  { %s347_s23 = scalar_lea.hbm %s465_s7, 256 }
 0x2fc   :  { %p348_p5 = scmp.ne.s32.totalorder %s465_s7, %s347_s23  ;;  %p351_p6 = scmp.lt.u32.totalorder %s347_s23, %s465_s7 }
 0x2fe   :  { %p353_p7 = pnand %p351_p6, %p348_p5 }
 0x300   :  { %356 = shalt.err (!%p353_p7)
}
 0x301   :  { %s360_s28 = smov 128   ;;  %s361_s29 = smov 8  }
 0x302   :  { %275 = dma.vmem_to_hbm [thread:$0]  %s270_s21, 256, %s465_s7, [#allocation3], %s360_s28, %s360_s28, %s361_s29  }
 0x303   :  { %357 = dma.done.wait [#allocation3], 256  }
 0x304   :  { %358 = vsyncadd [#allocation3], 4294967040 }
 0x305   :  { %279 = vsyncpa [#allocation3], 1 }

</bundles_post_ra>
